<compile_context>
chip_gen: v6e
topology: v6e:2x2x1
jax: 0.10.0
libtpu: 0.0.40
codegen_flags: <defaults>
</compile_context>

<pallas_src>
import math
from functools import partial

import jax
import jax.numpy as jnp
from jax.experimental import pallas as pl
from jax.experimental.pallas import tpu as pltpu

EPS = 1e-5          # nn.LayerNorm default eps
LANE = 128          # TPU lane width


def _round_up(n, m):
    return ((n + m - 1) // m) * m


# ---------------------------------------------------------------------------
# in-kernel helpers (traced inside the Pallas kernel) -- all f32
# ---------------------------------------------------------------------------
def _layernorm(x, w, b, mask, inv_d):
    # Padded lanes of x are exactly zero by construction, so the lane-sum for the mean only sees the
    # real D features; the centered difference is re-masked so padded lanes don't pollute the
    # variance.  Divide by the true D (inv_d), not the padded width.
    mu = jnp.sum(x, axis=-1, keepdims=True) * inv_d
    xc = (x - mu) * mask
    var = jnp.sum(xc * xc, axis=-1, keepdims=True) * inv_d
    return xc * jax.lax.rsqrt(var + EPS) * w + b


def _gelu_exact(x):
    # nn.GELU() default is the exact (erf) formulation
    return 0.5 * x * (1.0 + jax.lax.erf(x * (1.0 / math.sqrt(2.0))))


# ---------------------------------------------------------------------------
# fused kernel body: one grid step == one transformer block
# const_ref rows: 0 = input-proj bias, 1 = head LN w, 2 = head LN b, 3 = head w,
#                 4 (lane 0) = head bias, 5 = lane mask (1 on real features, 0 on padding)
# vec_ref  rows: 0 = ln1 w, 1 = ln1 b, 2 = fused attn bias, 3 = ln2 w, 4 = ln2 b, 5 = mlp b2
# ---------------------------------------------------------------------------
def fused_kernel(x_ref, ipw_ref, const_ref, wat_ref, w1_ref, w2_ref, vec_ref, b1_ref,
                 o_ref, xs_ref, *, inv_d):
    d = pl.program_id(0)
    mask = const_ref[5:6, :]

    # ---- input projection (runs once, first grid step); activation persists in VMEM scratch ----
    @pl.when(d == 0)
    def _():
        xs_ref[...] = (
            jnp.dot(x_ref[...].astype(jnp.bfloat16), ipw_ref[...],
                    preferred_element_type=jnp.float32)
            + const_ref[0:1, :])

    x = xs_ref[...]

    # ---- attention branch: x + out_proj(V(norm1(x)))  (softmax over seq==1 is identically 1) ----
    xn = _layernorm(x, vec_ref[0:1, :], vec_ref[1:2, :], mask, inv_d)
    x = x + jnp.dot(xn.astype(jnp.bfloat16), wat_ref[...],
                    preferred_element_type=jnp.float32) + vec_ref[2:3, :]

    # ---- MLP branch: x + W2(gelu(W1(norm2(x)))) ----
    xn2 = _layernorm(x, vec_ref[3:4, :], vec_ref[4:5, :], mask, inv_d)
    h = jnp.dot(xn2.astype(jnp.bfloat16), w1_ref[...],
                preferred_element_type=jnp.float32) + b1_ref[...]
    h = _gelu_exact(h)
    x = x + jnp.dot(h.astype(jnp.bfloat16), w2_ref[...],
                    preferred_element_type=jnp.float32) + vec_ref[5:6, :]

    xs_ref[...] = x

    # ---- head: LayerNorm + Linear(D -> 1) as a VPU multiply + lane reduction (last step only) ----
    @pl.when(d == pl.num_programs(0) - 1)
    def _():
        xn_h = _layernorm(x, const_ref[1:2, :], const_ref[2:3, :], mask, inv_d)
        o_ref[...] = (jnp.sum(xn_h * const_ref[3:4, :], axis=-1, keepdims=True)
                      + const_ref[4:5, 0:1])


def xtransformer_forward(x, prepared, *, dim, depth):
    """x: (B, input_dim) f32.  prepared: 7 packed/padded/pre-transposed arrays (see prepare_params)."""
    ipw, const, wat_s, w1_s, w2_s, vec_s, b1_s = prepared
    B = x.shape[0]
    B_pad = _round_up(B, 8)
    in_pad, d_pad = ipw.shape
    h_pad = w1_s.shape[-1]

    x_pad = jnp.pad(x, ((0, B_pad - B), (0, in_pad - x.shape[1])))

    nbytes = lambda a: a.size * a.dtype.itemsize
    per_layer_bytes = (nbytes(wat_s) + nbytes(w1_s) + nbytes(w2_s)
                       + nbytes(vec_s) + nbytes(b1_s)) // depth
    resident_bytes = nbytes(x_pad) + nbytes(ipw) + nbytes(const) + B_pad * d_pad * 4 + B_pad * 4
    vmem_limit = int(2 * per_layer_bytes + resident_bytes + (4 << 20))   # double-buffer + headroom

    flops = 2 * B_pad * (in_pad * d_pad
                         + depth * (d_pad * d_pad + 2 * d_pad * h_pad)
                         + d_pad)
    transcendentals = depth * B_pad * h_pad + (2 * depth + 1) * B_pad
    bytes_accessed = (nbytes(x_pad) + nbytes(ipw) + nbytes(const) + nbytes(wat_s)
                      + nbytes(w1_s) + nbytes(w2_s) + nbytes(vec_s) + nbytes(b1_s) + B_pad * 4)

    out = pl.pallas_call(
        partial(fused_kernel, inv_d=1.0 / dim),
        out_shape=jax.ShapeDtypeStruct((B_pad, 1), jnp.float32),
        grid=(depth,),
        in_specs=[
            pl.BlockSpec((B_pad, in_pad), lambda d: (0, 0)),          # x (fetched once)
            pl.BlockSpec((in_pad, d_pad), lambda d: (0, 0)),          # input-proj weight (bf16)
            pl.BlockSpec((8, d_pad), lambda d: (0, 0)),               # packed constants
            pl.BlockSpec((None, d_pad, d_pad), lambda d: (d, 0, 0)),  # fused attn weight per layer
            pl.BlockSpec((None, d_pad, h_pad), lambda d: (d, 0, 0)),  # MLP W1 per layer
            pl.BlockSpec((None, h_pad, d_pad), lambda d: (d, 0, 0)),  # MLP W2 per layer
            pl.BlockSpec((None, 8, d_pad), lambda d: (d, 0, 0)),      # packed per-layer vectors
            pl.BlockSpec((None, 1, h_pad), lambda d: (d, 0, 0)),      # MLP b1 per layer
        ],
        out_specs=pl.BlockSpec((B_pad, 1), lambda d: (0, 0)),
        scratch_shapes=[pltpu.VMEM((B_pad, d_pad), jnp.float32)],     # residual stream, persists
        compiler_params=pltpu.CompilerParams(
            dimension_semantics=("arbitrary",),
            vmem_limit_bytes=vmem_limit,
        ),
        cost_estimate=pl.CostEstimate(
            flops=flops, transcendentals=transcendentals, bytes_accessed=bytes_accessed),
    )(x_pad, ipw, const, wat_s, w1_s, w2_s, vec_s, b1_s)
    return out[:B]


# ---------------------------------------------------------------------------
# deterministic parameter construction (raw shapes follow the nn.Module __init__)
# ---------------------------------------------------------------------------
def _linear_params(key, out_d, in_d):
    kw, kb = jax.random.split(key)
    s = 1.0 / math.sqrt(in_d)
    w = jax.random.uniform(kw, (out_d, in_d), jnp.float32, -s, s)
    b = jax.random.uniform(kb, (1, out_d), jnp.float32, -s, s)
    return w, b


def _layernorm_params(key, d):
    kw, kb = jax.random.split(key)
    w = 1.0 + 0.1 * jax.random.normal(kw, (1, d), jnp.float32)
    b = 0.01 * jax.random.normal(kb, (1, d), jnp.float32)
    return w, b


def init_params(key, input_dim, dim, depth):
    k_ip, k_head, *k_blocks = jax.random.split(key, 2 + depth)

    ip = _linear_params(k_ip, dim, input_dim)

    blocks = []
    for kb in k_blocks:
        k = jax.random.split(kb, 6)
        ln1w, ln1b = _layernorm_params(k[0], dim)
        wqkv, bqkv = _linear_params(k[1], 3 * dim, dim)   # MHA fused in_proj (rows [q; k; v])
        wo, bo = _linear_params(k[2], dim, dim)           # MHA out_proj
        ln2w, ln2b = _layernorm_params(k[3], dim)
        w1, b1 = _linear_params(k[4], 4 * dim, dim)       # ff[0]
        w2, b2 = _linear_params(k[5], dim, 4 * dim)       # ff[3]
        blocks.append((ln1w, ln1b, wqkv, bqkv, wo, bo, ln2w, ln2b, w1, b1, w2, b2))

    kh_ln, kh_lin = jax.random.split(k_head)
    h_lnw, h_lnb = _layernorm_params(kh_ln, dim)
    h_w, h_b = _layernorm_params(kh_lin, 1)[0] * 0, None  # placeholder (overwritten below)
    h_w, h_b = _linear_params(kh_lin, 1, dim)
    head = (h_lnw, h_lnb, h_w, h_b)

    return ip, tuple(blocks), head


def prepare_params(params, input_dim, dim, depth):
    """Host-side: fuse Wv/Wo, pre-transpose, pad to 128-lane multiples, pack vectors, cast matmul
    weights to bf16, and stack per-layer tensors on a leading depth axis."""
    (ip_w, ip_b), blocks, (h_lnw, h_lnb, h_w, h_b) = params
    d_pad = _round_up(dim, LANE)
    h_pad = _round_up(4 * dim, LANE)
    in_pad = _round_up(input_dim, LANE)
    hp = jax.lax.Precision.HIGHEST

    def pad2(a, r, c):
        return jnp.pad(a, ((0, r - a.shape[0]), (0, c - a.shape[1])))

    ip_wt = pad2(ip_w.T, in_pad, d_pad).astype(jnp.bfloat16)

    # packed non-per-layer constants (8, d_pad), f32
    const = jnp.zeros((8, d_pad), jnp.float32)
    const = const.at[0, :dim].set(ip_b[0])
    const = const.at[1, :dim].set(h_lnw[0])
    const = const.at[2, :dim].set(h_lnb[0])
    const = const.at[3, :dim].set(h_w[0])
    const = const.at[4, 0].set(h_b[0, 0])
    const = const.at[5, :dim].set(1.0)          # lane mask over real features

    wat_s, w1_s, w2_s, vec_s, b1_s = [], [], [], [], []
    for (ln1w, ln1b, wqkv, bqkv, wo, bo, ln2w, ln2b, w1, b1, w2, b2) in blocks:
        wv = wqkv[2 * dim:3 * dim, :]                 # only V rows matter at seq_len == 1
        bv = bqkv[:, 2 * dim:3 * dim]
        wat_t = jnp.matmul(wv.T, wo.T, precision=hp)  # == (Wo @ Wv).T, right-multiply form
        bat = jnp.matmul(bv, wo.T, precision=hp) + bo

        wat_s.append(pad2(wat_t, d_pad, d_pad).astype(jnp.bfloat16))
        w1_s.append(pad2(w1.T, d_pad, h_pad).astype(jnp.bfloat16))
        w2_s.append(pad2(w2.T, h_pad, d_pad).astype(jnp.bfloat16))

        vec = jnp.zeros((8, d_pad), jnp.float32)
        vec = vec.at[0, :dim].set(ln1w[0])
        vec = vec.at[1, :dim].set(ln1b[0])
        vec = vec.at[2, :dim].set(bat[0])
        vec = vec.at[3, :dim].set(ln2w[0])
        vec = vec.at[4, :dim].set(ln2b[0])
        vec = vec.at[5, :dim].set(b2[0])
        vec_s.append(vec)
        b1_s.append(pad2(b1, 1, h_pad))

    stk = lambda xs: jnp.stack(xs, axis=0)
    return (ip_wt, const, stk(wat_s), stk(w1_s), stk(w2_s), stk(vec_s), stk(b1_s))


# ---------------------------------------------------------------------------
# pure-JAX reference (full QKV + per-head softmax, f32) for a correctness check
# ---------------------------------------------------------------------------
def reference_forward(x, params, *, dim, heads):
    (ip_w, ip_b), blocks, (h_lnw, h_lnb, h_w, h_b) = params
    hp = jax.lax.Precision.HIGHEST

    def ln(v, w, b):
        mu = jnp.mean(v, axis=-1, keepdims=True)
        var = jnp.mean((v - mu) ** 2, axis=-1, keepdims=True)
        return (v - mu) * jax.lax.rsqrt(var + EPS) * w + b

    B = x.shape[0]
    dh = dim // heads
    x = jnp.matmul(x, ip_w.T, precision=hp) + ip_b          # (B, dim); seq dim of 1 is implicit
    for (ln1w, ln1b, wqkv, bqkv, wo, bo, ln2w, ln2b, w1, b1, w2, b2) in blocks:
        xn = ln(x, ln1w, ln1b)
        qkv = jnp.matmul(xn, wqkv.T, precision=hp) + bqkv
        q, k, v = jnp.split(qkv, 3, axis=-1)
        qh = q.reshape(B, heads, 1, dh)
        kh = k.reshape(B, heads, 1, dh)
        vh = v.reshape(B, heads, 1, dh)
        scores = jnp.einsum('bhqd,bhkd->bhqk', qh, kh, precision=hp) / math.sqrt(dh)
        aw = jax.nn.softmax(scores, axis=-1)                 # identically 1 at seq_len == 1
        ah = jnp.einsum('bhqk,bhkd->bhqd', aw, vh, precision=hp).reshape(B, dim)
        x = x + jnp.matmul(ah, wo.T, precision=hp) + bo
        xn2 = ln(x, ln2w, ln2b)
        h = jnp.matmul(xn2, w1.T, precision=hp) + b1
        h = 0.5 * h * (1.0 + jax.lax.erf(h / math.sqrt(2.0)))
        x = x + jnp.matmul(h, w2.T, precision=hp) + b2
    xn = ln(x, h_lnw, h_lnb)
    return jnp.matmul(xn, h_w.T, precision=hp) + h_b


if __name__ == "__main__":
    B, INPUT_DIM, DIM, DEPTH, HEADS = 8, 32, 64, 4, 4

    key = jax.random.PRNGKey(0)
    kx, kp = jax.random.split(key)
    x = jax.random.normal(kx, (B, INPUT_DIM), jnp.float32)
    params = init_params(kp, INPUT_DIM, DIM, DEPTH)
    prepared = prepare_params(params, INPUT_DIM, DIM, DEPTH)

    fwd = jax.jit(partial(xtransformer_forward, dim=DIM, depth=DEPTH))
    y = jax.block_until_ready(fwd(x, prepared))

    assert y.shape == (B, 1) and y.dtype == jnp.float32
    assert bool(jnp.all(jnp.isfinite(y)))

    # Tolerance accounts for bf16 matmul weights/operands vs. the f32 HIGHEST-precision reference.
    y_ref = reference_forward(x, params, dim=DIM, heads=HEADS)
    assert bool(jnp.allclose(y, y_ref, atol=5e-2, rtol=5e-2)), (y, y_ref)
    print("KERNEL_OK")
</pallas_src>

<mosaic_0001>
module attributes {stable_mosaic.version = 11 : i64} {
  func.func @fused_kernel(%arg0: i32, %arg1: memref<8x128xf32, #tpu.memory_space<vmem>>, %arg2: memref<128x128xbf16, #tpu.memory_space<vmem>>, %arg3: memref<8x128xf32, #tpu.memory_space<vmem>>, %arg4: memref<1x128x128xbf16, #tpu.memory_space<vmem>>, %arg5: memref<1x128x256xbf16, #tpu.memory_space<vmem>>, %arg6: memref<1x256x128xbf16, #tpu.memory_space<vmem>>, %arg7: memref<1x8x128xf32, #tpu.memory_space<vmem>>, %arg8: memref<1x1x256xf32, #tpu.memory_space<vmem>>, %arg9: memref<8x1xf32, #tpu.memory_space<vmem>>, %arg10: memref<8x128xf32, #tpu.memory_space<vmem>>) attributes {dimension_semantics = [#tpu.dimension_semantics<arbitrary>], iteration_bounds = array<i64: 4>, scalar_prefetch = 0 : i64, scratch_operands = 1 : i64, tpu.core_type = #tpu.core_type<tc>, window_params = [{pipeline_mode = #tpu.pipeline_mode<synchronous>, transform_indices = @transform_0, window_bounds = array<i64: 8, 128>}, {pipeline_mode = #tpu.pipeline_mode<synchronous>, transform_indices = @transform_1, window_bounds = array<i64: 128, 128>}, {pipeline_mode = #tpu.pipeline_mode<synchronous>, transform_indices = @transform_2, window_bounds = array<i64: 8, 128>}, {transform_indices = @transform_3, window_bounds = array<i64: 1, 128, 128>}, {transform_indices = @transform_4, window_bounds = array<i64: 1, 128, 256>}, {transform_indices = @transform_5, window_bounds = array<i64: 1, 256, 128>}, {transform_indices = @transform_6, window_bounds = array<i64: 1, 8, 128>}, {transform_indices = @transform_7, window_bounds = array<i64: 1, 1, 256>}, {pipeline_mode = #tpu.pipeline_mode<synchronous>, transform_indices = @transform_8, window_bounds = array<i64: 8, 1>}]} {
    %c5 = arith.constant 5 : index
    %c0 = arith.constant 0 : index
    %0 = vector.load %arg3[%c5, %c0] : memref<8x128xf32, #tpu.memory_space<vmem>>, vector<1x128xf32>
    %c0_i32 = arith.constant 0 : i32
    %1 = arith.cmpi eq, %arg0, %c0_i32 : i32
    %2 = arith.extui %1 : i1 to i32
    %c0_i32_0 = arith.constant 0 : i32
    %3 = arith.cmpi ne, %2, %c0_i32_0 : i32
    scf.if %3 {
      %c0_47 = arith.constant 0 : index
      %c0_48 = arith.constant 0 : index
      %95 = vector.load %arg1[%c0_47, %c0_48] : memref<8x128xf32, #tpu.memory_space<vmem>>, vector<8x128xf32>
      %96 = arith.truncf %95 : vector<8x128xf32> to vector<8x128xbf16>
      %c0_49 = arith.constant 0 : index
      %c0_50 = arith.constant 0 : index
      %97 = vector.load %arg2[%c0_49, %c0_50] : memref<128x128xbf16, #tpu.memory_space<vmem>>, vector<128x128xbf16>
      %cst_51 = arith.constant dense<0.000000e+00> : vector<8x128xf32>
      %98 = tpu.matmul %96, %97, %cst_51 {dimension_numbers = #tpu.dot_dimension_numbers<[1], [0], [0], [1], [0, 0, 1, 1], [], []>} : vector<8x128xbf16>, vector<128x128xbf16>, vector<8x128xf32> -> vector<8x128xf32>
      %c0_52 = arith.constant 0 : index
      %c0_53 = arith.constant 0 : index
      %99 = vector.load %arg3[%c0_52, %c0_53] : memref<8x128xf32, #tpu.memory_space<vmem>>, vector<1x128xf32>
      %100 = vector.broadcast %99 : vector<1x128xf32> to vector<8x128xf32>
      %101 = arith.addf %98, %100 : vector<8x128xf32>
      %c0_54 = arith.constant 0 : index
      %c0_55 = arith.constant 0 : index
      %102 = vector.load %arg10[%c0_54, %c0_55] : memref<8x128xf32, #tpu.memory_space<vmem>>, vector<8x128xf32>
      tpu.vector_store %arg10[%c0_54, %c0_55], %101 {strides = array<i32>} : memref<8x128xf32, #tpu.memory_space<vmem>>, vector<8x128xf32>,
    } else {
    }
    %c0_1 = arith.constant 0 : index
    %c0_2 = arith.constant 0 : index
    %4 = vector.load %arg10[%c0_1, %c0_2] : memref<8x128xf32, #tpu.memory_space<vmem>>, vector<8x128xf32>
    %c0_3 = arith.constant 0 : index
    %c0_4 = arith.constant 0 : index
    %c0_5 = arith.constant 0 : index
    %5 = vector.load %arg7[%c0_3, %c0_4, %c0_5] : memref<1x8x128xf32, #tpu.memory_space<vmem>>, vector<1x1x128xf32>
    %6 = vector.shape_cast %5 : vector<1x1x128xf32> to vector<1x128xf32>
    %c0_6 = arith.constant 0 : index
    %c1 = arith.constant 1 : index
    %c0_7 = arith.constant 0 : index
    %7 = vector.load %arg7[%c0_6, %c1, %c0_7] : memref<1x8x128xf32, #tpu.memory_space<vmem>>, vector<1x1x128xf32>
    %8 = vector.shape_cast %7 : vector<1x1x128xf32> to vector<1x128xf32>
    %cst = arith.constant dense<0.000000e+00> : vector<8xf32>
    %9 = vector.multi_reduction <add>, %4, %cst [1] : vector<8x128xf32> to vector<8xf32>
    %10 = vector.shape_cast %9 : vector<8xf32> to vector<8x1xf32>
    %cst_8 = arith.constant 1.562500e-02 : f32
    %11 = vector.broadcast %cst_8 : f32 to vector<8x1xf32>
    %12 = arith.mulf %10, %11 : vector<8x1xf32>
    %13 = vector.broadcast %12 : vector<8x1xf32> to vector<8x128xf32>
    %14 = arith.subf %4, %13 : vector<8x128xf32>
    %15 = vector.broadcast %0 : vector<1x128xf32> to vector<8x128xf32>
    %16 = arith.mulf %14, %15 : vector<8x128xf32>
    %17 = arith.mulf %16, %16 : vector<8x128xf32>
    %cst_9 = arith.constant dense<0.000000e+00> : vector<8xf32>
    %18 = vector.multi_reduction <add>, %17, %cst_9 [1] : vector<8x128xf32> to vector<8xf32>
    %19 = vector.shape_cast %18 : vector<8xf32> to vector<8x1xf32>
    %cst_10 = arith.constant 1.562500e-02 : f32
    %20 = vector.broadcast %cst_10 : f32 to vector<8x1xf32>
    %21 = arith.mulf %19, %20 : vector<8x1xf32>
    %cst_11 = arith.constant 9.99999974E-6 : f32
    %22 = vector.broadcast %cst_11 : f32 to vector<8x1xf32>
    %23 = arith.addf %21, %22 : vector<8x1xf32>
    %24 = math.rsqrt %23 : vector<8x1xf32>
    %25 = vector.broadcast %24 : vector<8x1xf32> to vector<8x128xf32>
    %26 = arith.mulf %16, %25 : vector<8x128xf32>
    %27 = vector.broadcast %6 : vector<1x128xf32> to vector<8x128xf32>
    %28 = arith.mulf %26, %27 : vector<8x128xf32>
    %29 = vector.broadcast %8 : vector<1x128xf32> to vector<8x128xf32>
    %30 = arith.addf %28, %29 : vector<8x128xf32>
    %31 = arith.truncf %30 : vector<8x128xf32> to vector<8x128xbf16>
    %c0_12 = arith.constant 0 : index
    %c0_13 = arith.constant 0 : index
    %c0_14 = arith.constant 0 : index
    %32 = vector.load %arg4[%c0_12, %c0_13, %c0_14] : memref<1x128x128xbf16, #tpu.memory_space<vmem>>, vector<1x128x128xbf16>
    %33 = vector.shape_cast %32 : vector<1x128x128xbf16> to vector<128x128xbf16>
    %cst_15 = arith.constant dense<0.000000e+00> : vector<8x128xf32>
    %34 = tpu.matmul %31, %33, %cst_15 {dimension_numbers = #tpu.dot_dimension_numbers<[1], [0], [0], [1], [0, 0, 1, 1], [], []>} : vector<8x128xbf16>, vector<128x128xbf16>, vector<8x128xf32> -> vector<8x128xf32>
    %35 = arith.addf %4, %34 : vector<8x128xf32>
    %c0_16 = arith.constant 0 : index
    %c2 = arith.constant 2 : index
    %c0_17 = arith.constant 0 : index
    %36 = vector.load %arg7[%c0_16, %c2, %c0_17] : memref<1x8x128xf32, #tpu.memory_space<vmem>>, vector<1x1x128xf32>
    %37 = vector.shape_cast %36 : vector<1x1x128xf32> to vector<1x128xf32>
    %38 = vector.broadcast %37 : vector<1x128xf32> to vector<8x128xf32>
    %39 = arith.addf %35, %38 : vector<8x128xf32>
    %c0_18 = arith.constant 0 : index
    %c3 = arith.constant 3 : index
    %c0_19 = arith.constant 0 : index
    %40 = vector.load %arg7[%c0_18, %c3, %c0_19] : memref<1x8x128xf32, #tpu.memory_space<vmem>>, vector<1x1x128xf32>
    %41 = vector.shape_cast %40 : vector<1x1x128xf32> to vector<1x128xf32>
    %c0_20 = arith.constant 0 : index
    %c4 = arith.constant 4 : index
    %c0_21 = arith.constant 0 : index
    %42 = vector.load %arg7[%c0_20, %c4, %c0_21] : memref<1x8x128xf32, #tpu.memory_space<vmem>>, vector<1x1x128xf32>
    %43 = vector.shape_cast %42 : vector<1x1x128xf32> to vector<1x128xf32>
    %cst_22 = arith.constant dense<0.000000e+00> : vector<8xf32>
    %44 = vector.multi_reduction <add>, %39, %cst_22 [1] : vector<8x128xf32> to vector<8xf32>
    %45 = vector.shape_cast %44 : vector<8xf32> to vector<8x1xf32>
    %cst_23 = arith.constant 1.562500e-02 : f32
    %46 = vector.broadcast %cst_23 : f32 to vector<8x1xf32>
    %47 = arith.mulf %45, %46 : vector<8x1xf32>
    %48 = vector.broadcast %47 : vector<8x1xf32> to vector<8x128xf32>
    %49 = arith.subf %39, %48 : vector<8x128xf32>
    %50 = vector.broadcast %0 : vector<1x128xf32> to vector<8x128xf32>
    %51 = arith.mulf %49, %50 : vector<8x128xf32>
    %52 = arith.mulf %51, %51 : vector<8x128xf32>
    %cst_24 = arith.constant dense<0.000000e+00> : vector<8xf32>
    %53 = vector.multi_reduction <add>, %52, %cst_24 [1] : vector<8x128xf32> to vector<8xf32>
    %54 = vector.shape_cast %53 : vector<8xf32> to vector<8x1xf32>
    %cst_25 = arith.constant 1.562500e-02 : f32
    %55 = vector.broadcast %cst_25 : f32 to vector<8x1xf32>
    %56 = arith.mulf %54, %55 : vector<8x1xf32>
    %cst_26 = arith.constant 9.99999974E-6 : f32
    %57 = vector.broadcast %cst_26 : f32 to vector<8x1xf32>
    %58 = arith.addf %56, %57 : vector<8x1xf32>
    %59 = math.rsqrt %58 : vector<8x1xf32>
    %60 = vector.broadcast %59 : vector<8x1xf32> to vector<8x128xf32>
    %61 = arith.mulf %51, %60 : vector<8x128xf32>
    %62 = vector.broadcast %41 : vector<1x128xf32> to vector<8x128xf32>
    %63 = arith.mulf %61, %62 : vector<8x128xf32>
    %64 = vector.broadcast %43 : vector<1x128xf32> to vector<8x128xf32>
    %65 = arith.addf %63, %64 : vector<8x128xf32>
    %66 = arith.truncf %65 : vector<8x128xf32> to vector<8x128xbf16>
    %c0_27 = arith.constant 0 : index
    %c0_28 = arith.constant 0 : index
    %c0_29 = arith.constant 0 : index
    %67 = vector.load %arg5[%c0_27, %c0_28, %c0_29] : memref<1x128x256xbf16, #tpu.memory_space<vmem>>, vector<1x128x256xbf16>
    %68 = vector.shape_cast %67 : vector<1x128x256xbf16> to vector<128x256xbf16>
    %cst_30 = arith.constant dense<0.000000e+00> : vector<8x256xf32>
    %69 = tpu.matmul %66, %68, %cst_30 {dimension_numbers = #tpu.dot_dimension_numbers<[1], [0], [0], [1], [0, 0, 1, 1], [], []>} : vector<8x128xbf16>, vector<128x256xbf16>, vector<8x256xf32> -> vector<8x256xf32>
    %c0_31 = arith.constant 0 : index
    %c0_32 = arith.constant 0 : index
    %c0_33 = arith.constant 0 : index
    %70 = vector.load %arg8[%c0_31, %c0_32, %c0_33] : memref<1x1x256xf32, #tpu.memory_space<vmem>>, vector<1x1x256xf32>
    %71 = vector.shape_cast %70 : vector<1x1x256xf32> to vector<1x256xf32>
    %72 = vector.broadcast %71 : vector<1x256xf32> to vector<8x256xf32>
    %73 = arith.addf %69, %72 : vector<8x256xf32>
    %cst_34 = arith.constant 5.000000e-01 : f32
    %74 = vector.broadcast %cst_34 : f32 to vector<8x256xf32>
    %75 = arith.mulf %74, %73 : vector<8x256xf32>
    %cst_35 = arith.constant 0.707106769 : f32
    %76 = vector.broadcast %cst_35 : f32 to vector<8x256xf32>
    %77 = arith.mulf %73, %76 : vector<8x256xf32>
    %78 = math.erf %77 : vector<8x256xf32>
    %cst_36 = arith.constant 1.000000e+00 : f32
    %79 = vector.broadcast %cst_36 : f32 to vector<8x256xf32>
    %80 = arith.addf %79, %78 : vector<8x256xf32>
    %81 = arith.mulf %75, %80 : vector<8x256xf32>
    %82 = arith.truncf %81 : vector<8x256xf32> to vector<8x256xbf16>
    %c0_37 = arith.constant 0 : index
    %c0_38 = arith.constant 0 : index
    %c0_39 = arith.constant 0 : index
    %83 = vector.load %arg6[%c0_37, %c0_38, %c0_39] : memref<1x256x128xbf16, #tpu.memory_space<vmem>>, vector<1x256x128xbf16>
    %84 = vector.shape_cast %83 : vector<1x256x128xbf16> to vector<256x128xbf16>
    %cst_40 = arith.constant dense<0.000000e+00> : vector<8x128xf32>
    %85 = tpu.matmul %82, %84, %cst_40 {dimension_numbers = #tpu.dot_dimension_numbers<[1], [0], [0], [1], [0, 0, 1, 1], [], []>} : vector<8x256xbf16>, vector<256x128xbf16>, vector<8x128xf32> -> vector<8x128xf32>
    %86 = arith.addf %39, %85 : vector<8x128xf32>
    %c0_41 = arith.constant 0 : index
    %c5_42 = arith.constant 5 : index
    %c0_43 = arith.constant 0 : index
    %87 = vector.load %arg7[%c0_41, %c5_42, %c0_43] : memref<1x8x128xf32, #tpu.memory_space<vmem>>, vector<1x1x128xf32>
    %88 = vector.shape_cast %87 : vector<1x1x128xf32> to vector<1x128xf32>
    %89 = vector.broadcast %88 : vector<1x128xf32> to vector<8x128xf32>
    %90 = arith.addf %86, %89 : vector<8x128xf32>
    %c0_44 = arith.constant 0 : index
    %c0_45 = arith.constant 0 : index
    %91 = vector.load %arg10[%c0_44, %c0_45] : memref<8x128xf32, #tpu.memory_space<vmem>>, vector<8x128xf32>
    tpu.vector_store %arg10[%c0_44, %c0_45], %90 {strides = array<i32>} : memref<8x128xf32, #tpu.memory_space<vmem>>, vector<8x128xf32>,
    %c3_i32 = arith.constant 3 : i32
    %92 = arith.cmpi eq, %arg0, %c3_i32 : i32
    %93 = arith.extui %92 : i1 to i32
    %c0_i32_46 = arith.constant 0 : i32
    %94 = arith.cmpi ne, %93, %c0_i32_46 : i32
    scf.if %94 {
      %c1_47 = arith.constant 1 : index
      %c0_48 = arith.constant 0 : index
      %95 = vector.load %arg3[%c1_47, %c0_48] : memref<8x128xf32, #tpu.memory_space<vmem>>, vector<1x128xf32>
      %c2_49 = arith.constant 2 : index
      %c0_50 = arith.constant 0 : index
      %96 = vector.load %arg3[%c2_49, %c0_50] : memref<8x128xf32, #tpu.memory_space<vmem>>, vector<1x128xf32>
      %cst_51 = arith.constant dense<0.000000e+00> : vector<8xf32>
      %97 = vector.multi_reduction <add>, %90, %cst_51 [1] : vector<8x128xf32> to vector<8xf32>
      %98 = vector.shape_cast %97 : vector<8xf32> to vector<8x1xf32>
      %cst_52 = arith.constant 1.562500e-02 : f32
      %99 = vector.broadcast %cst_52 : f32 to vector<8x1xf32>
      %100 = arith.mulf %98, %99 : vector<8x1xf32>
      %101 = vector.broadcast %100 : vector<8x1xf32> to vector<8x128xf32>
      %102 = arith.subf %90, %101 : vector<8x128xf32>
      %103 = vector.broadcast %0 : vector<1x128xf32> to vector<8x128xf32>
      %104 = arith.mulf %102, %103 : vector<8x128xf32>
      %105 = arith.mulf %104, %104 : vector<8x128xf32>
      %cst_53 = arith.constant dense<0.000000e+00> : vector<8xf32>
      %106 = vector.multi_reduction <add>, %105, %cst_53 [1] : vector<8x128xf32> to vector<8xf32>
      %107 = vector.shape_cast %106 : vector<8xf32> to vector<8x1xf32>
      %cst_54 = arith.constant 1.562500e-02 : f32
      %108 = vector.broadcast %cst_54 : f32 to vector<8x1xf32>
      %109 = arith.mulf %107, %108 : vector<8x1xf32>
      %cst_55 = arith.constant 9.99999974E-6 : f32
      %110 = vector.broadcast %cst_55 : f32 to vector<8x1xf32>
      %111 = arith.addf %109, %110 : vector<8x1xf32>
      %112 = math.rsqrt %111 : vector<8x1xf32>
      %113 = vector.broadcast %112 : vector<8x1xf32> to vector<8x128xf32>
      %114 = arith.mulf %104, %113 : vector<8x128xf32>
      %115 = vector.broadcast %95 : vector<1x128xf32> to vector<8x128xf32>
      %116 = arith.mulf %114, %115 : vector<8x128xf32>
      %117 = vector.broadcast %96 : vector<1x128xf32> to vector<8x128xf32>
      %118 = arith.addf %116, %117 : vector<8x128xf32>
      %c3_56 = arith.constant 3 : index
      %c0_57 = arith.constant 0 : index
      %119 = vector.load %arg3[%c3_56, %c0_57] : memref<8x128xf32, #tpu.memory_space<vmem>>, vector<1x128xf32>
      %120 = vector.broadcast %119 : vector<1x128xf32> to vector<8x128xf32>
      %121 = arith.mulf %118, %120 : vector<8x128xf32>
      %cst_58 = arith.constant dense<0.000000e+00> : vector<8xf32>
      %122 = vector.multi_reduction <add>, %121, %cst_58 [1] : vector<8x128xf32> to vector<8xf32>
      %123 = vector.shape_cast %122 : vector<8xf32> to vector<8x1xf32>
      %c4_59 = arith.constant 4 : index
      %c0_60 = arith.constant 0 : index
      %124 = vector.load %arg3[%c4_59, %c0_60] : memref<8x128xf32, #tpu.memory_space<vmem>>, vector<1x1xf32>
      %125 = vector.broadcast %124 : vector<1x1xf32> to vector<8x1xf32>
      %126 = arith.addf %123, %125 : vector<8x1xf32>
      %c0_61 = arith.constant 0 : index
      %c0_62 = arith.constant 0 : index
      %127 = vector.load %arg9[%c0_61, %c0_62] : memref<8x1xf32, #tpu.memory_space<vmem>>, vector<8x1xf32>
      tpu.vector_store %arg9[%c0_61, %c0_62], %126 {strides = array<i32>} : memref<8x1xf32, #tpu.memory_space<vmem>>, vector<8x1xf32>,
    } else {
    }
    return
  }
  func.func @transform_0(%arg0: i32) -> (i32, i32) {
    %c0_i32 = arith.constant 0 : i32
    %c0_i32_0 = arith.constant 0 : i32
    %c0_i32_1 = arith.constant 0 : i32
    return %c0_i32, %c0_i32_0 : i32, i32
  }
  func.func @transform_1(%arg0: i32) -> (i32, i32) {
    %c0_i32 = arith.constant 0 : i32
    %c0_i32_0 = arith.constant 0 : i32
    %c0_i32_1 = arith.constant 0 : i32
    return %c0_i32, %c0_i32_0 : i32, i32
  }
  func.func @transform_2(%arg0: i32) -> (i32, i32) {
    %c0_i32 = arith.constant 0 : i32
    %c0_i32_0 = arith.constant 0 : i32
    %c0_i32_1 = arith.constant 0 : i32
    return %c0_i32, %c0_i32_0 : i32, i32
  }
  func.func @transform_3(%arg0: i32) -> (i32, i32, i32) {
    %c0_i32 = arith.constant 0 : i32
    %c0_i32_0 = arith.constant 0 : i32
    %c0_i32_1 = arith.constant 0 : i32
    return %arg0, %c0_i32, %c0_i32_0 : i32, i32, i32
  }
  func.func @transform_4(%arg0: i32) -> (i32, i32, i32) {
    %c0_i32 = arith.constant 0 : i32
    %c0_i32_0 = arith.constant 0 : i32
    %c0_i32_1 = arith.constant 0 : i32
    return %arg0, %c0_i32, %c0_i32_0 : i32, i32, i32
  }
  func.func @transform_5(%arg0: i32) -> (i32, i32, i32) {
    %c0_i32 = arith.constant 0 : i32
    %c0_i32_0 = arith.constant 0 : i32
    %c0_i32_1 = arith.constant 0 : i32
    return %arg0, %c0_i32, %c0_i32_0 : i32, i32, i32
  }
  func.func @transform_6(%arg0: i32) -> (i32, i32, i32) {
    %c0_i32 = arith.constant 0 : i32
    %c0_i32_0 = arith.constant 0 : i32
    %c0_i32_1 = arith.constant 0 : i32
    return %arg0, %c0_i32, %c0_i32_0 : i32, i32, i32
  }
  func.func @transform_7(%arg0: i32) -> (i32, i32, i32) {
    %c0_i32 = arith.constant 0 : i32
    %c0_i32_0 = arith.constant 0 : i32
    %c0_i32_1 = arith.constant 0 : i32
    return %arg0, %c0_i32, %c0_i32_0 : i32, i32, i32
  }
  func.func @transform_8(%arg0: i32) -> (i32, i32) {
    %c0_i32 = arith.constant 0 : i32
    %c0_i32_0 = arith.constant 0 : i32
    %c0_i32_1 = arith.constant 0 : i32
    return %c0_i32, %c0_i32_0 : i32, i32
  }
}

</mosaic_0001>

<bundles_post_ra>
// kernel: xtransformer_forward.1
= control target key start
LH: loop header
LB: loop body
LE: loop exit
PB: predicated region body
PF: predicated region fallthrough
CT: control target
= control target key end

     0   :  { %s2140_s0 = inlined_call_operand.vmem [shape: f32[8,128], index: 0, kind: input, shape index: {}]   ;;  %s2141_s1 = inlined_call_operand.hbm [shape: bf16[128,128], index: 1, kind: input, shape index: {}]   ;;  %s2142_s2 = inlined_call_operand.vmem [shape: f32[8,128], index: 2, kind: input, shape index: {}]   ;;  %s2143_s3 = inlined_call_operand.hbm [shape: bf16[4,128,128], index: 3, kind: input, shape index: {}]   ;;  %s2144_s4 = inlined_call_operand.hbm [shape: bf16[4,128,256], index: 4, kind: input, shape index: {}]   ;;  %s2145_s5 = inlined_call_operand.hbm [shape: bf16[4,256,128], index: 5, kind: input, shape index: {}]   ;;  %s2146_s6 = inlined_call_operand.hbm [shape: f32[4,8,128], index: 6, kind: input, shape index: {}]   ;;  %s2147_s7 = inlined_call_operand.vmem [shape: f32[4,1,256], index: 7, kind: input, shape index: {}]   ;;  %s2148_s8 = inlined_call_operand.vmem [shape: f32[8,1], index: 8, kind: output, shape index: {}]  }
   0x1   :  { %2161 = sst [smem:[#allocation17_spill]] %s2143_s3 }
   0x2   :  { %2162 = sst [smem:[#allocation18_spill]] %s2145_s5 }
   0x3   :  { %13 = vsyncpa [#allocation4], 0 }
   0x4   :  { %14 = vsyncpa [#allocation6], 0 }
   0x5   :  { %16 = vsyncpa [#allocation6 + $0x1], 0 }
   0x6   :  { %17 = vsyncpa [#allocation9], 0 }
   0x7   :  { %19 = vsyncpa [#allocation9 + $0x1], 0  ;;  %s1795_s27 = smov 0   ;;  %s1797_s28 = smov 0  }
   0x8   :  { %s1799_s29 = smov 0   ;;  %s1801_s30 = smov 0  }
   0x9 LB: > { %2163 = sst [smem:[#allocation14_spill]] %s1730_s29  ;;  %s1816_s9 = sadd.s32 1, %s1734_s30   ;;  %s1734_s30 = sphi %s1801_s30, %s2183_s30   ;;  %s1730_s29 = sphi %s1799_s29, %s2185_s29   ;;  %s1726_s28 = sphi %s1797_s28, %s2187_s28   ;;  %s1722_s27 = sphi %s1795_s27, %s2186_s27  }
   0xa   : > { %2164 = sst [smem:[#allocation15_spill]] %s1816_s9  ;;  %s95_s10 = sadd.s32 1, %s1730_s29 }
   0xb   : > { %s92_s11 = ssub.s32 %s1734_s30, %s1816_s9  ;;  %p102_p0 = scmp.ne.s32.totalorder %s1730_s29, %s1726_s28 }
   0xc   : > { %p93_p1 = scmp.eq.s32.totalorder %s92_s11, 0  ;;  %p103_p2 = scmp.eq.s32.totalorder %s1734_s30, 0 }
   0xd   : > { %p1444_p4 = scmp.lt.s32.totalorder %s1734_s30, 4  ;;  %s2149_s13 = sand.u32 1, %s1734_s30  }
   0xe   : > { %s1825_s12 = scalar_select %p93_p1, %s1730_s29, %s95_s10  }
   0xf   : > { %p104_p3 = por %p103_p2, %p102_p0  ;;  %s1830_s14 = sand.u32 1, %s1730_s29  }
  0x10   : > { %2165 = sst [smem:[#allocation16_spill]] %s1825_s12  ;;  %s1249_s15 = sshll.u32 %s1830_s14, 6 }
  0x11   : > { %s1331_s16 = sshll.u32 %s1734_s30, 10  ;;  %s2166_s3 = sld [smem:[#allocation17_spill]] }
  0x12   : > { %s280_s20 = scalar_lea.vmem [#allocation5], %s1249_s15  ;;  %p1839_p5 = pnand %p1444_p4, %p104_p3 }
  0x13   : > { %s287_s21 = sshll.u32 %s280_s20, 4  ;;  %s1252_s23 = sshll.u32 %s1830_s14, 7  ;;  %s1843_s21 = int_to_ptr.vmem [resolvable:$true] %s287_s21 }
  0x14   : > { %s1848_s24 = scalar_lea.sflag [#allocation6], %s2149_s13  ;;  %p1854_p7 = pneg %p1839_p5 }
  0x17   : > { %s1837_s19 = scalar_lea.hbm %s2166_s3, %s1331_s16  ;;  %s1559_s15 = scalar_lea.hbm %s2166_s3, 4096 }
  0x18   : > { %s1554_s25 = scalar_lea.hbm %s1837_s19, 1024  ;;  %p1560_p10 = scmp.lt.s32.totalorder %s1837_s19, %s2166_s3 }
  0x19   : > { %p1555_p6 = scmp.ne.s32.totalorder %s1837_s19, %s1554_s25  ;;  %p1561_p11 = scmp.lt.s32.totalorder %s1559_s15, %s1554_s25 }
  0x1b   : > { %p1557_p8 = pnand %p1854_p7, %p1555_p6  ;;  %p1562_p12 = por %p1561_p11, %p1560_p10 }
  0x1d   : > { %p1558_p9 = pneg %p1557_p8 }
  0x1f   : > { %p1563_p13 = pnand %p1562_p12, %p1558_p9 }
  0x21   : > { %1566 = shalt.err (!%p1563_p13)
}
  0x22   : > { %s1567_s18 = scalar_lea.vmem %s1843_s21, 1024  ;;  %s1736_s20 = smov [#allocation5]  }
  0x23   : > { %p1568_p0 = scmp.ne.s32.totalorder %s1843_s21, %s1567_s18  ;;  %s1572_s10 = sshll.u32 %s1736_s20, 4  ;;  %s1573_s10 = int_to_ptr.vmem [resolvable:$false] %s1572_s10 }
  0x24   : > { %s1574_s11 = scalar_lea.vmem %s1573_s10, 2048  ;;  %p1575_p3 = scmp.lt.s32.totalorder %s1843_s21, %s1573_s10 }
  0x25   : > { %p1570_p1 = pnand %p1568_p0, %p1854_p7  ;;  %p1576_p4 = scmp.lt.s32.totalorder %s1574_s11, %s1567_s18 }
  0x27   : > { %p1571_p2 = pneg %p1570_p1  ;;  %p1577_p6 = por %p1576_p4, %p1575_p3 }
  0x29   : > { %p1578_p8 = pnand %p1577_p6, %p1571_p2 }
  0x2b   : > { %1581 = shalt.err (!%p1578_p8)
}
  0x2c   : > { %s2150_s25 = smov 64   ;;  %s2152_s15 = smov 4  }
  0x2d   : > { %1433 = dma.hbm_to_vmem [thread:$0]  (!%p1839_p5), %s1837_s19, 1024, %s1843_s21, %s1848_s24, %s2150_s25, %s2150_s25, %s2152_s15  }
  0x2e   : > { %s1332_s16 = sshll.u32 %s1734_s30, 11  ;;  %s301_s17 = scalar_lea.vmem [#allocation7], %s1252_s23 }
  0x2f   : > { %s308_s18 = sshll.u32 %s301_s17, 4  ;;  %s1886_s11 = scalar_lea.hbm %s2144_s4, %s1332_s16  ;;  %s1888_s18 = int_to_ptr.vmem [resolvable:$true] %s308_s18 }
  0x30   : > { %s2169_s5 = sld [smem:[#allocation18_spill]]  ;;  %s322_s19 = scalar_lea.vmem [#allocation8], %s1252_s23 }
  0x31   : > { %s329_s21 = sshll.u32 %s322_s19, 4  ;;  %s2170_s17 = sand.u32 1, %s1734_s30   ;;  %s1897_s21 = int_to_ptr.vmem [resolvable:$true] %s329_s21 }
  0x32   : > { %s1901_s25 = scalar_lea.sflag [#allocation9], %s2170_s17 }
  0x36   : > { %s1893_s12 = scalar_lea.hbm %s2169_s5, %s1332_s16  ;;  %s1587_s13 = scalar_lea.hbm %s2169_s5, 8192 }
  0x37   : > { %s1582_s20 = scalar_lea.hbm %s1893_s12, 2048  ;;  %p1588_p12 = scmp.lt.s32.totalorder %s1893_s12, %s2169_s5 }
  0x38   : > { %p1583_p9 = scmp.ne.s32.totalorder %s1893_s12, %s1582_s20  ;;  %p1589_p13 = scmp.lt.s32.totalorder %s1587_s13, %s1582_s20 }
  0x3a   : > { %p1585_p10 = pnand %p1583_p9, %p1854_p7  ;;  %p1590_p0 = por %p1589_p13, %p1588_p12 }
  0x3c   : > { %p1586_p11 = pneg %p1585_p10 }
  0x3e   : > { %p1591_p1 = pnand %p1590_p0, %p1586_p11 }
  0x40   : > { %1594 = shalt.err (!%p1591_p1)
}
  0x41   : > { %s1595_s23 = scalar_lea.vmem %s1897_s21, 2048  ;;  %s1739_s19 = smov [#allocation8]  }
  0x42   : > { %p1596_p2 = scmp.ne.s32.totalorder %s1897_s21, %s1595_s23  ;;  %s1600_s17 = sshll.u32 %s1739_s19, 4  ;;  %s1601_s17 = int_to_ptr.vmem [resolvable:$false] %s1600_s17 }
  0x43   : > { %s1602_s10 = scalar_lea.vmem %s1601_s17, 4096  ;;  %p1603_p6 = scmp.lt.s32.totalorder %s1897_s21, %s1601_s17 }
  0x44   : > { %p1598_p3 = pnand %p1596_p2, %p1854_p7  ;;  %p1604_p8 = scmp.lt.s32.totalorder %s1602_s10, %s1595_s23 }
  0x46   : > { %p1599_p4 = pneg %p1598_p3  ;;  %p1605_p9 = por %p1604_p8, %p1603_p6 }
  0x48   : > { %p1606_p10 = pnand %p1605_p9, %p1599_p4 }
  0x4a   : > { %1609 = shalt.err (!%p1606_p10)
}
  0x4b   : > { %s2171_s15 = smov 4   ;;  %s2172_s20 = smov 64  }
  0x4c   : > { %1439 = dma.hbm_to_vmem [thread:$0]  (!%p1839_p5), %s1893_s12, 2048, %s1897_s21, %s1901_s25, %s2172_s20, %s2172_s20, %s2171_s15  }
  0x4d   : > { %s1928_s3 = sadd.s32 4294967295, %s1734_s30   ;;  %p108_p11 = scmp.ne.s32.totalorder %s1726_s28, %s1722_s27 }
  0x4e   : > { %p2157_p12 = scmp.eq.s32.totalorder %s1928_s3, 0  ;;  %p1246_p13 = scmp.ge.s32.totalorder %s1734_s30, 1 }
  0x4f   : > { %p244_p0 = scmp.lt.s32.totalorder %s1734_s30, 5  ;;  %s1740_s21 = smov [#allocation3]  }
  0x50   : > { %p1937_p1 = por %p2157_p12, %p108_p11  ;;  %s259_s16 = sshll.u32 %s1740_s21, 4  ;;  %s1948_s16 = int_to_ptr.vmem [resolvable:$true] %s259_s16 }
  0x51   : > { %p1942_p3 = pnand %p1246_p13, %p244_p0  ;;  %s1610_s19 = scalar_lea.hbm %s1886_s11, 2048 }
  0x52   : > { %s2173_s13 = scalar_select %p1937_p1, 1, 0 }
  0x53   : > { %s2174_s12 = scalar_select %p1942_p3, 1, 0 }
  0x54   : > { %p1426_p4 = pneg %p1942_p3  ;;  %p1611_p8 = scmp.ne.s32.totalorder %s1886_s11, %s1610_s19 }
  0x55   : > { %s1615_s5 = scalar_lea.hbm %s2144_s4, 8192  ;;  %p1616_p11 = scmp.lt.s32.totalorder %s1886_s11, %s2144_s4 }
  0x56   : > { %p1953_p6 = pnand %p1426_p4, %p2157_p12  ;;  %p1613_p9 = pnand %p1611_p8, %p1854_p7 }
  0x57   : > { %p1617_p13 = scmp.lt.s32.totalorder %s1615_s5, %s1610_s19 }
  0x58   : > { %s2175_s23 = scalar_select %p1953_p6, 1, 0 }
  0x59   : > { %p1614_p10 = pneg %p1613_p9  ;;  %p1618_p0 = por %p1617_p13, %p1616_p11 }
  0x5b   : > { %p1619_p2 = pnand %p1618_p0, %p1614_p10 }
  0x5d   : > { %1622 = shalt.err (!%p1619_p2)
}
  0x5e   : > { %s1623_s27 = scalar_lea.vmem %s1888_s18, 2048  ;;  %s1741_s9 = smov [#allocation7]  }
  0x5f   : > { %p1624_p4 = scmp.ne.s32.totalorder %s1888_s18, %s1623_s27  ;;  %s1628_s17 = sshll.u32 %s1741_s9, 4  ;;  %s1629_s17 = int_to_ptr.vmem [resolvable:$false] %s1628_s17 }
  0x60   : > { %s1630_s10 = scalar_lea.vmem %s1629_s17, 4096  ;;  %p1631_p12 = scmp.lt.s32.totalorder %s1888_s18, %s1629_s17 }
  0x61   : > { %p1626_p8 = pnand %p1624_p4, %p1854_p7  ;;  %p1632_p1 = scmp.lt.s32.totalorder %s1630_s10, %s1623_s27 }
  0x63   : > { %p1627_p9 = pneg %p1626_p8  ;;  %p1633_p3 = por %p1632_p1, %p1631_p12 }
  0x65   : > { %p1634_p6 = pnand %p1633_p3, %p1627_p9 }
  0x67   : > { %1637 = shalt.err (!%p1634_p6)
}
  0x68   : > { %s1742_s5 = smov 128   ;;  %s1743_s29 = smov 8  }
  0x69   : > { %1436 = dma.hbm_to_vmem [thread:$0]  (!%p1839_p5), %s1886_s11, 2048, %s1888_s18, %s1848_s24, %s1742_s5, %s1742_s5, %s1743_s29  }
  0x6a   : > { %s1259_s9 = sshll.u32 %s1734_s30, 7  ;;  %p2176_p2 = scmp.ne.s32.totalorder %s2175_s23, 0 }
  0x6b   : > { %s1649_s27 = scalar_lea.vmem %s1948_s16, 1024  ;;  %p1657_p6 = scmp.lt.s32.totalorder %s1948_s16, %s1948_s16 }
  0x6c   : > { %p1640_p10 = pneg %p2176_p2  ;;  %p1650_p12 = scmp.ne.s32.totalorder %s1948_s16, %s1649_s27 }
  0x6d   : > { %p1658_p11 = scmp.lt.s32.totalorder %s1649_s27, %s1649_s27 }
  0x6e   : > { %p1652_p1 = pnand %p1650_p12, %p1640_p10 }
  0x6f   : > { %p1659_p13 = por %p1658_p11, %p1657_p6 }
  0x70   : > { %p1653_p3 = pneg %p1652_p1 }
  0x72   : > { %p1660_p0 = pnand %p1659_p13, %p1653_p3 }
  0x74   : > { %1663 = shalt.err (!%p1660_p0)
}
  0x75   : > { %1429 = dma.hbm_to_vmem [thread:$0]  (!%p2176_p2), %s2141_s1, 1024, %s1948_s16, [#allocation4], %s2172_s20, %s2172_s20, %s2171_s15  }
  0x76   : > { %s348_s19 = scalar_lea.hbm %s2146_s6, %s1259_s9  ;;  %s2177_s21 = sshll.u32 %s1830_s14, 3 }
  0x77   : > { %s343_s17 = scalar_lea.vmem [#allocation10], %s2177_s21  ;;  %s1664_s5 = scalar_lea.hbm %s348_s19, 128 }
  0x78   : > { %s350_s10 = sshll.u32 %s343_s17, 4  ;;  %p1665_p4 = scmp.ne.s32.totalorder %s348_s19, %s1664_s5  ;;  %s351_s10 = int_to_ptr.vmem [resolvable:$true] %s350_s10 }
  0x79   : > { %s1669_s27 = scalar_lea.hbm %s2146_s6, 512  ;;  %p1670_p2 = scmp.lt.s32.totalorder %s348_s19, %s2146_s6 }
  0x7a   : > { %p1667_p8 = pnand %p1665_p4, %p1854_p7  ;;  %p1671_p10 = scmp.lt.s32.totalorder %s1669_s27, %s1664_s5 }
  0x7c   : > { %p1668_p9 = pneg %p1667_p8  ;;  %p1672_p12 = por %p1671_p10, %p1670_p2 }
  0x7e   : > { %p1673_p1 = pnand %p1672_p12, %p1668_p9 }
  0x80   : > { %1676 = shalt.err (!%p1673_p1)
}
  0x81   : > { %s1677_s14 = scalar_lea.vmem %s351_s10, 128  ;;  %s1744_s15 = smov [#allocation10]  }
  0x82   : > { %p1678_p3 = scmp.ne.s32.totalorder %s351_s10, %s1677_s14  ;;  %s1682_s20 = sshll.u32 %s1744_s15, 4  ;;  %s1683_s20 = int_to_ptr.vmem [resolvable:$false] %s1682_s20 }
  0x83   : > { %s1684_s16 = scalar_lea.vmem %s1683_s20, 256  ;;  %p1685_p13 = scmp.lt.s32.totalorder %s351_s10, %s1683_s20 }
  0x84   : > { %p1680_p6 = pnand %p1678_p3, %p1854_p7  ;;  %p1686_p0 = scmp.lt.s32.totalorder %s1684_s16, %s1677_s14 }
  0x86   : > { %p1681_p11 = pneg %p1680_p6  ;;  %p1687_p4 = por %p1686_p0, %p1685_p13 }
  0x88   : > { %p1688_p8 = pnand %p1687_p4, %p1681_p11 }
  0x8a   : > { %1691 = shalt.err (!%p1688_p8)
}
  0x8b   : > { %1442 = dma.hbm_to_vmem [thread:$0]  (!%p1839_p5), %s348_s19, 128, %s351_s10, %s1901_s25  }
  0x8c   : > { %p2178_p9 = scmp.ne.s32.totalorder %s2174_s12, 0 }
  0x8d   : > { %p2179_p2 = scmp.eq.s32.totalorder (!%p2178_p9), %s1928_s3, 0 }
  0x8e   : > { %366 = sbr.rel (%p2178_p9) target bundleno = 2090 (0x82a), region = 52 }
  0x93   : > { %1709 = dma.done.wait (%p2179_p2), [#allocation4], 1024   ;;  %p2180_p7 = pmov %p2179_p2 }
  0x94   : > { %s372_s26 = sand.u32 1, %s1928_s3   ;;  %s374_s9 = sand.u32 1, %s1726_s28  }
  0x95   : > { %1711 = vsyncadd (%p2180_p7), [#allocation4], 4294966272  ;;  %s1262_s18 = sshll.u32 %s374_s9, 6  ;;  %s373_s11 = scalar_lea.sflag [#allocation6], %s372_s26 }
  0x96   : > { %s2020_s21 = scalar_lea.vmem [#allocation5], %s1262_s18  ;;  %p2181_p10 = scmp.ne.s32.totalorder %s2173_s13, 0 }
  0x98   : > { %1713 = dma.done.wait (%p2181_p10), %s373_s11, 3072  }
  0x99   : > { %1715 = vsyncadd (%p2181_p10), %s373_s11, 4294964224  ;;  %s1263_s22 = sshll.u32 %s374_s9, 7  ;;  %s391_s12 = scalar_lea.sflag [#allocation9], %s372_s26 }
  0x9a   : > { %s2026_s25 = scalar_lea.vmem [#allocation7], %s1263_s22  ;;  %s2028_s19 = scalar_lea.vmem [#allocation8], %s1263_s22 }
  0x9b   : > { %1717 = dma.done.wait (%p2181_p10), %s391_s12, 2176  }
  0x9c   : > { %1719 = vsyncadd (%p2181_p10), %s391_s12, 4294965120  ;;  %s1265_s17 = sshll.u32 %s374_s9, 3  ;;  %p450_p5 = scmp.lt.s32.totalorder %s1928_s3, 3  ;;  %v2044_v0 = vld [vmem:[%s2142_s2 + $0x5] ss:$0 sm:$0xff] }
  0x9d   : > { %s2046_s14 = scalar_lea.vmem [#allocation10], %s1265_s17  ;;  %p2182_p12 = scmp.ne.s32.totalorder %s1928_s3, 0 }
  0x9e   : > { %s451_s10 = scalar_select %p450_p5, %s1928_s3, 3 }
  0x9f   : > { %459 = sbr.rel (%p2182_p12) target bundleno = 396 (0x18c), region = 76 }
  0xa0   : > { %s1266_s5 = sshll.u32 %s451_s10, 1 }
  0xa1   : > { %s2039_s27 = scalar_lea.vmem %s2147_s7, %s1266_s5 }
  0xa4   : > { %v1488_v1 = vld [vmem:[#allocation3 + $0x38] sm:$0xff]   ;;  %v1745_v2 = vmov 0.0   ;;  %v1489_v3 = vld [vmem:[#allocation3 + $0x30] sm:$0xff]   ;;  %vm1746_vm0 = vmmov 0   ;;  %v1490_v4 = vld [vmem:[#allocation3 + $0x28] sm:$0xff]  }
  0xa5   : > { %1374 = vmatprep.subr.bf16.mxu0 %v1745_v2  ;;  %1390 = vmatprep.mubr.msk.bf16.mxu0 %vm1746_vm0, %v1745_v2  ;;  %v1491_v5 = vld [vmem:[#allocation3 + $0x20] sm:$0xff]   ;;  %v1492_v6 = vld [vmem:[#allocation3 + $0x18] sm:$0xff]   ;;  %v1493_v7 = vld [vmem:[#allocation3 + $0x10] sm:$0xff]  }
  0xa6   : > { %1375 = vmatpush3.bf16.msra.mxu0 %v1488_v1  ;;  %v1494_v8 = vld [vmem:[#allocation3 + $0x8] sm:$0xff]   ;;  %v1495_v9 = vld [vmem:[#allocation3] sm:$0xff]   ;;  %v460_v10 = vld [vmem:[%s2140_s0] sm:$0xff] }
  0xa7   : > { %1376 = vmatprep.subr.bf16.mxu0 %v1745_v2  ;;  %v461_v11 = vpack.c.bf16 %v460_v10, %v460_v10  ;;  %v1268_v12 = vld [vmem:[%s2142_s2] ss:$0 sm:$0xff] }
  0xaa   : > { %1377 = vmatpush3.bf16.msra.mxu0 %v1489_v3 }
  0xab   : > { %1378 = vmatprep.subr.bf16.mxu0 %v1745_v2 }
  0xae   : > { %1379 = vmatpush3.bf16.msra.mxu0 %v1490_v4 }
  0xaf   : > { %1380 = vmatprep.subr.bf16.mxu0 %v1745_v2 }
  0xb2   : > { %1381 = vmatpush3.bf16.msra.mxu0 %v1491_v5 }
  0xb3   : > { %1382 = vmatprep.subr.bf16.mxu0 %v1745_v2 }
  0xb6   : > { %1383 = vmatpush3.bf16.msra.mxu0 %v1492_v6 }
  0xb7   : > { %1384 = vmatprep.subr.bf16.mxu0 %v1745_v2 }
  0xba   : > { %1385 = vmatpush3.bf16.msra.mxu0 %v1493_v7 }
  0xbb   : > { %1386 = vmatprep.subr.bf16.mxu0 %v1745_v2 }
  0xbe   : > { %1387 = vmatpush3.bf16.msra.mxu0 %v1494_v8 }
  0xbf   : > { %1388 = vmatprep.subr.bf16.mxu0 %v1745_v2 }
  0xc2   : > { %1389 = vmatpush3.bf16.msra.mxu0 %v1495_v9 }
  0xc5   : > { %1391 = vmatmul.mubr.bf16.vlgmr.msra.gmra.mxu0 %v461_v11 }
 0x185   : > { %v565_v13 = vpop.f32.mrf.mxu0 }
 0x186   : > { %v566_v14 = vadd.f32 %v1268_v12, %v565_v13 }
 0x187   : > { %v1392_v15 = vpop.f32.mrf.mxu0 }
 0x188   : > { %571 = vst [vmem:[#allocation2] sm:$0xff] %v566_v14 }
 0x189   : > { %v568_v16 = vpop.f32.mrf.mxu0 }
 0x18b   : > { %v1393_v17 = vpop.f32.mrf.mxu0 }
 0x18c PF: > { %v1496_v19 = vld [vmem:[%s2020_s21 + $0x38] sm:$0xff]   ;;  %v1497_v20 = vld [vmem:[%s2020_s21 + $0x30] sm:$0xff]   ;;  %v1747_v21 = vmov 0.0   ;;  %v1498_v27 = vld [vmem:[%s2020_s21 + $0x28] sm:$0xff]   ;;  %vm1748_vm1 = vmmov 0   ;;  %v1749_v3 = vmov 0  }
 0x18d   : > { %1394 = vmatprep.subr.bf16.mxu0 %v1747_v21  ;;  %v1499_v28 = vld [vmem:[%s2020_s21 + $0x20] sm:$0xff]   ;;  %1410 = vmatprep.mubr.msk.bf16.mxu0 %vm1748_vm1, %v1747_v21  ;;  %v1500_v29 = vld [vmem:[%s2020_s21 + $0x18] sm:$0xff]   ;;  %v1501_v30 = vld [vmem:[%s2020_s21 + $0x10] sm:$0xff]   ;;  %p1324_p1 = scmp.ne.s32.totalorder %s1928_s3, 3 }
 0x18e   : > { %1395 = vmatpush3.bf16.msra.mxu0 %v1496_v19  ;;  %v1502_v31 = vld [vmem:[%s2020_s21 + $0x8] sm:$0xff]   ;;  %v1503_v32 = vld [vmem:[%s2020_s21] sm:$0xff]   ;;  %v1504_v50 = vld [vmem:[%s2026_s25 + $0x74] ss:$8 sps:$4 sm:$0xff]   ;;  %878 = vmatprep.mubr.bf16.mxu1 %v1749_v3 }
 0x18f   : > { %v572_v18 = vld [vmem:[#allocation2] sm:$0xff]  ;;  %1396 = vmatprep.subr.bf16.mxu0 %v1747_v21  ;;  %v1278_v37 = vld [vmem:[%s2046_s14] ss:$0 sm:$0xff]  ;;  %v1279_v39 = vld [vmem:[%s2046_s14 + $0x1] ss:$0 sm:$0xff]  ;;  %846 = vmatprep.subr.bf16.mxu1 %v1504_v50 }
 0x190   : > { %575 = vadd.xlane.f32.xlu0 %v572_v18  ;;  %v1288_v44 = vld [vmem:[%s2046_s14 + $0x2] ss:$0 sm:$0xff]  ;;  %v1506_v51 = vld [vmem:[%s2026_s25 + $0x70] ss:$8 sps:$4 sm:$0xff]   ;;  %v1507_v52 = vld [vmem:[%s2026_s25 + $0x64] ss:$8 sps:$4 sm:$0xff]  }
 0x191   : > { %847 = vmatpush1.bf16.msra.mxu1 %v1506_v51  ;;  %v1509_v53 = vld [vmem:[%s2026_s25 + $0x60] ss:$8 sps:$4 sm:$0xff]   ;;  %v1510_v59 = vld [vmem:[%s2026_s25 + $0x54] ss:$8 sps:$4 sm:$0xff]   ;;  %v1512_v60 = vld [vmem:[%s2026_s25 + $0x50] ss:$8 sps:$4 sm:$0xff]  }
 0x192   : > { %1397 = vmatpush3.bf16.msra.mxu0 %v1497_v20  ;;  %848 = vmatprep.subr.bf16.mxu1 %v1507_v52  ;;  %v1513_v61 = vld [vmem:[%s2026_s25 + $0x44] ss:$8 sps:$4 sm:$0xff]   ;;  %v1515_v62 = vld [vmem:[%s2026_s25 + $0x40] ss:$8 sps:$4 sm:$0xff]   ;;  %v1516_v63 = vld [vmem:[%s2026_s25 + $0x34] ss:$8 sps:$4 sm:$0xff]  }
 0x193   : > { %1398 = vmatprep.subr.bf16.mxu0 %v1747_v21  ;;  %v1518_v1 = vld [vmem:[%s2026_s25 + $0x30] ss:$8 sps:$4 sm:$0xff]   ;;  %v1519_v2 = vld [vmem:[%s2026_s25 + $0x24] ss:$8 sps:$4 sm:$0xff]   ;;  %v1521_v4 = vld [vmem:[%s2026_s25 + $0x20] ss:$8 sps:$4 sm:$0xff]  }
 0x194   : > { %v1522_v5 = vld [vmem:[%s2026_s25 + $0x14] ss:$8 sps:$4 sm:$0xff]   ;;  %v1524_v6 = vld [vmem:[%s2026_s25 + $0x10] ss:$8 sps:$4 sm:$0xff]   ;;  %v1525_v7 = vld [vmem:[%s2026_s25 + $0x4] ss:$8 sps:$4 sm:$0xff]  }
 0x195   : > { %849 = vmatpush1.bf16.msra.mxu1 %v1509_v53  ;;  %v1527_v8 = vld [vmem:[%s2026_s25] ss:$8 sps:$4 sm:$0xff]   ;;  %v1528_v9 = vld [vmem:[%s2028_s19 + $0x78] sm:$0xff]   ;;  %v1290_v17 = vld [vmem:[%s2046_s14 + $0x4] ss:$0 sm:$0xff] }
 0x196   : > { %1399 = vmatpush3.bf16.msra.mxu0 %v1498_v27  ;;  %850 = vmatprep.subr.bf16.mxu1 %v1510_v59  ;;  %v1529_v10 = vld [vmem:[%s2028_s19 + $0x38] sm:$0xff]   ;;  %v1289_v15 = vld [vmem:[%s2046_s14 + $0x3] ss:$0 sm:$0xff] }
 0x197   : > { %1400 = vmatprep.subr.bf16.mxu0 %v1747_v21  ;;  %v1536_v27 = vld [vmem:[%s2028_s19 + $0x58] sm:$0xff]  }
 0x199   : > { %851 = vmatpush1.bf16.msra.mxu1 %v1512_v60 }
 0x19a   : > { %1401 = vmatpush3.bf16.msra.mxu0 %v1499_v28  ;;  %852 = vmatprep.subr.bf16.mxu1 %v1513_v61  ;;  %v1537_v28 = vld [vmem:[%s2028_s19 + $0x18] sm:$0xff]  }
 0x19b   : > { %1402 = vmatprep.subr.bf16.mxu0 %v1747_v21 }
 0x19d   : > { %853 = vmatpush1.bf16.msra.mxu1 %v1515_v62 }
 0x19e   : > { %1403 = vmatpush3.bf16.msra.mxu0 %v1500_v29  ;;  %854 = vmatprep.subr.bf16.mxu1 %v1516_v63  ;;  %v1538_v29 = vld [vmem:[%s2028_s19 + $0x50] sm:$0xff]  }
 0x19f   : > { %1404 = vmatprep.subr.bf16.mxu0 %v1747_v21 }
 0x1a1   : > { %855 = vmatpush1.bf16.msra.mxu1 %v1518_v1  ;;  %v1323_v1 = vld [vmem:[%s2046_s14 + $0x5] ss:$0 sm:$0xff] }
 0x1a2   : > { %1405 = vmatpush3.bf16.msra.mxu0 %v1501_v30  ;;  %856 = vmatprep.subr.bf16.mxu1 %v1519_v2  ;;  %v1539_v30 = vld [vmem:[%s2028_s19 + $0x10] sm:$0xff]  }
 0x1a3   : > { %1406 = vmatprep.subr.bf16.mxu0 %v1747_v21 }
 0x1a5   : > { %857 = vmatpush1.bf16.msra.mxu1 %v1521_v4 }
 0x1a6   : > { %1407 = vmatpush3.bf16.msra.mxu0 %v1502_v31  ;;  %858 = vmatprep.subr.bf16.mxu1 %v1522_v5  ;;  %v1540_v31 = vld [vmem:[%s2028_s19 + $0x48] sm:$0xff]  }
 0x1a7   : > { %1408 = vmatprep.subr.bf16.mxu0 %v1747_v21  ;;  %v1530_v21 = vld [vmem:[%s2028_s19 + $0x70] sm:$0xff]  }
 0x1a9   : > { %859 = vmatpush1.bf16.msra.mxu1 %v1524_v6 }
 0x1aa   : > { %1409 = vmatpush3.bf16.msra.mxu0 %v1503_v32  ;;  %860 = vmatprep.subr.bf16.mxu1 %v1525_v7  ;;  %v1541_v32 = vld [vmem:[%s2028_s19 + $0x8] sm:$0xff]  }
 0x1ab   : > { %1352 = vmatprep.subr.bf16.mxu0 %v1528_v9 }
 0x1ad   : > { %861 = vmatpush1.bf16.msra.mxu1 %v1527_v8 }
 0x219   : > { %v576_v22 = vpop.xlane.xlu0 %575 }
 0x21a   : > { %v577_v23 = vmul.f32 0.015625, %v576_v22  ;;  %v1531_v22 = vld [vmem:[%s2028_s19 + $0x30] sm:$0xff]  }
 0x21c   : > { %v578_v24 = vsub.f32 %v572_v18, %v577_v23  ;;  %v1532_v23 = vld [vmem:[%s2028_s19 + $0x68] sm:$0xff]  }
 0x21e   : > { %v583_v25 = vmul.f32 %v2044_v0, %v578_v24  ;;  %v1533_v24 = vld [vmem:[%s2028_s19 + $0x28] sm:$0xff]  }
 0x220   : > { %v584_v26 = vmul.f32 %v583_v25, %v583_v25 }
 0x222   : > { %585 = vadd.xlane.f32.xlu0 %v584_v26  ;;  %v1535_v26 = vld [vmem:[%s2028_s19 + $0x20] sm:$0xff]  }
 0x2ab   : > { %v586_v33 = vpop.xlane.xlu0 %585 }
 0x2ac   : > { %v587_v34 = vmul.f32 0.015625, %v586_v33  ;;  %v1542_v33 = vld [vmem:[%s2028_s19 + $0x40] sm:$0xff]  }
 0x2ae   : > { %v588_v35 = vadd.f32 1e-05, %v587_v34  ;;  %v1543_v34 = vld [vmem:[%s2028_s19] sm:$0xff]  }
 0x2b0   : > { %1544 = vrsqrt.f32 %v588_v35  ;;  %v756_v35 = vlaneseq }
 0x2bd   : > { %v1545_v36 = vpop.eup %1544 }
 0x2be   : > { %v590_v38 = vmul.f32 %v1545_v36, %v583_v25  ;;  %v1534_v25 = vld [vmem:[%s2028_s19 + $0x60] sm:$0xff]   ;;  %v757_v36 = vshrl.u32 %v756_v35, 7 }
 0x2c0   : > { %v595_v40 = vmul.f32 %v1278_v37, %v590_v38  ;;  %v758_v37 = vsub.s32 0, %v757_v36  ;;  %v754_v38 = vld [vmem:[%s2039_s27] sm:$0x3] }
 0x2c2   : > { %v600_v41 = vadd.f32 %v1279_v39, %v595_v40  ;;  %v762_v39 = vsub.s32 1, %v757_v36  ;;  %v759_v40 = vrot.slane %v754_v38, %v758_v37 }
 0x2c4   : > { %v601_v42 = vpack.c.bf16 %v600_v41, %v600_v41  ;;  %v763_v41 = vrot.slane %v754_v38, %v762_v39 }
 0x2c6   : > { %1411 = vmatmul.mubr.bf16.vlgmr.msra.gmra.mxu0 %v601_v42 }
 0x2c7   : > { %1353 = vmatpush3.bf16.msra.mxu0 %v1529_v10 }
 0x2c8   : > { %1354 = vmatprep.subr.bf16.mxu0 %v1530_v21 }
 0x2cb   : > { %1355 = vmatpush3.bf16.msra.mxu0 %v1531_v22 }
 0x2cc   : > { %1356 = vmatprep.subr.bf16.mxu0 %v1532_v23 }
 0x2cf   : > { %1357 = vmatpush3.bf16.msra.mxu0 %v1533_v24 }
 0x2d0   : > { %1358 = vmatprep.subr.bf16.mxu0 %v1534_v25 }
 0x2d3   : > { %1359 = vmatpush3.bf16.msra.mxu0 %v1535_v26 }
 0x2d4   : > { %1360 = vmatprep.subr.bf16.mxu0 %v1536_v27 }
 0x2d7   : > { %1361 = vmatpush3.bf16.msra.mxu0 %v1537_v28 }
 0x2d8   : > { %1362 = vmatprep.subr.bf16.mxu0 %v1538_v29 }
 0x2db   : > { %1363 = vmatpush3.bf16.msra.mxu0 %v1539_v30 }
 0x2dc   : > { %1364 = vmatprep.subr.bf16.mxu0 %v1540_v31 }
 0x2df   : > { %1365 = vmatpush3.bf16.msra.mxu0 %v1541_v32 }
 0x2e0   : > { %1366 = vmatprep.subr.bf16.mxu0 %v1542_v33 }
 0x2e3   : > { %1367 = vmatpush3.bf16.msra.mxu0 %v1543_v34 }
 0x386   : > { %v700_v43 = vpop.f32.mrf.mxu0 }
 0x387   : > { %v706_v45 = vadd.f32 %v700_v43, %v572_v18 }
 0x388   : > { %v1412_v46 = vpop.f32.mrf.mxu0 }
 0x389   : > { %v2068_v47 = vadd.f32 %v1288_v44, %v706_v45 }
 0x38a   : > { %v703_v48 = vpop.f32.mrf.mxu0 }
 0x38b   : > { %715 = vadd.xlane.f32.xlu1 %v2068_v47 }
 0x38c   : > { %v1413_v49 = vpop.f32.mrf.mxu0 }
 0x414   : > { %v716_v54 = vpop.xlane.xlu1 %715 }
 0x415   : > { %v717_v55 = vmul.f32 0.015625, %v716_v54 }
 0x417   : > { %v718_v56 = vsub.f32 %v2068_v47, %v717_v55 }
 0x419   : > { %v719_v57 = vmul.f32 %v2044_v0, %v718_v56 }
 0x41b   : > { %v720_v58 = vmul.f32 %v719_v57, %v719_v57 }
 0x41d   : > { %721 = vadd.xlane.f32.xlu1 %v720_v58 }
 0x4a6   : > { %v722_v11 = vpop.xlane.xlu1 %721 }
 0x4a7   : > { %v723_v12 = vmul.f32 0.015625, %v722_v11 }
 0x4a9   : > { %v724_v13 = vadd.f32 1e-05, %v723_v12 }
 0x4ab   : > { %1546 = vrsqrt.f32 %v724_v13 }
 0x4b8   : > { %v1547_v14 = vpop.eup %1546 }
 0x4b9   : > { %v726_v16 = vmul.f32 %v1547_v14, %v719_v57 }
 0x4bb   : > { %v731_v18 = vmul.f32 %v1289_v15, %v726_v16 }
 0x4bd   : > { %v736_v19 = vadd.f32 %v1290_v17, %v731_v18 }
 0x4bf   : > { %v737_v20 = vpack.c.bf16 %v736_v19, %v736_v19 }
 0x4c1   : > { %879 = vmatmul.mubr.bf16.vlgmr.msra.gmra.mxu1 %v737_v20 }
 0x581   : > { %v880_v42 = vpop.f32.mrf.mxu1 }
 0x582   : > { %v881_v43 = vadd.f32 %v880_v42, %v759_v40 }
 0x583   : > { %v882_v44 = vpop.f32.mrf.mxu1 }
 0x584   : > { %v889_v45 = vmul.f32 0.70710677, %v881_v43  ;;  %v883_v46 = vadd.f32 %v882_v44, %v763_v41  ;;  %v887_v54 = vmul.f32 0.5, %v881_v43 }
 0x585   : > { %v884_v48 = vpop.f32.mrf.mxu1 }
 0x586   : > { %1548 = verf.f32 %v889_v45  ;;  %v890_v49 = vmul.f32 0.70710677, %v883_v46  ;;  %v888_v55 = vmul.f32 0.5, %v883_v46 }
 0x587   : > { %v885_v50 = vpop.f32.mrf.mxu1 }
 0x588   : > { %1550 = verf.f32 %v890_v49 }
 0x593   : > { %v1549_v51 = vpop.eup %1548 }
 0x594   : > { %v893_v52 = vadd.f32 1.0, %v1549_v51 }
 0x595   : > { %v1551_v53 = vpop.eup %1550 }
 0x596   : > { %v894_v56 = vadd.f32 1.0, %v1551_v53  ;;  %v895_v57 = vmul.f32 %v893_v52, %v887_v54 }
 0x598   : > { %v896_v58 = vmul.f32 %v894_v56, %v888_v55  ;;  %v897_v60 = vpack.c.bf16 %v895_v57, %v895_v57 }
 0x59a   : > { %v898_v59 = vpack.c.bf16 %v896_v58, %v896_v58 }
 0x59c   : > { %1059 = vmatprep.mubr.bf16.mxu0 %v898_v59 }
 0x59d   : > { %1060 = vmatmul.mubr.bf16.vlgmr.msra.gmra.mxu0 %v897_v60 }
 0x65d   : > { %v1368_v61 = vpop.f32.mrf.mxu0 }
 0x65f   : > { %v1369_v62 = vpop.f32.mrf.mxu0 }
 0x660   : > { %v1370_v63 = vadd.f32 %v1369_v62, %v1368_v61 }
 0x661   : > { %v1371_v2 = vpop.f32.mrf.mxu0 }
 0x662   : > { %v1067_v3 = vadd.f32 %v1370_v63, %v2068_v47  ;;  %1078 = sbr.rel (%p1324_p1) target bundleno = 2090 (0x82a), region = 80 }
 0x663   : > { %v1372_v4 = vpop.f32.mrf.mxu0 }
 0x664   : > { %v1073_v5 = vadd.f32 %v1323_v1, %v1067_v3 }
 0x666   : > { %1074 = vst [vmem:[#allocation2] sm:$0xff] %v1073_v5 }
 0x667   : > { %1081 = vadd.xlane.f32.xlu0 %v1073_v5  ;;  %v1325_v47 = vld [vmem:[%s2142_s2 + $0x1] ss:$0 sm:$0xff]  ;;  %v1326_v16 = vld [vmem:[%s2142_s2 + $0x2] ss:$0 sm:$0xff]  ;;  %v1328_v20 = vld [vmem:[%s2142_s2 + $0x4] ss:$0 sm:$0xff] }
 0x668   : > { %vm1117_vm2 = vcmask 7168  }
 0x6f0   : > { %v1082_v6 = vpop.xlane.xlu0 %1081 }
 0x6f1   : > { %v1083_v7 = vmul.f32 0.015625, %v1082_v6 }
 0x6f3   : > { %v1084_v8 = vsub.f32 %v1073_v5, %v1083_v7 }
 0x6f5   : > { %v1085_v9 = vmul.f32 %v2044_v0, %v1084_v8  ;;  %v1327_v0 = vld [vmem:[%s2142_s2 + $0x3] ss:$0 sm:$0xff] }
 0x6f7   : > { %v1086_v10 = vmul.f32 %v1085_v9, %v1085_v9 }
 0x6f9   : > { %1087 = vadd.xlane.f32.xlu0 %v1086_v10 }
 0x782   : > { %v1088_v11 = vpop.xlane.xlu0 %1087 }
 0x783   : > { %v1089_v12 = vmul.f32 0.015625, %v1088_v11 }
 0x785   : > { %v1090_v13 = vadd.f32 1e-05, %v1089_v12 }
 0x787   : > { %1552 = vrsqrt.f32 %v1090_v13 }
 0x794   : > { %v1553_v14 = vpop.eup %1552 }
 0x795   : > { %v1092_v15 = vmul.f32 %v1553_v14, %v1085_v9 }
 0x797   : > { %v1097_v17 = vmul.f32 %v1325_v47, %v1092_v15 }
 0x799   : > { %v1102_v18 = vadd.f32 %v1326_v16, %v1097_v17 }
 0x79b   : > { %v1108_v19 = vmul.f32 %v1327_v0, %v1102_v18 }
 0x79d   : > { %1109 = vadd.xlane.f32.xlu1 %v1108_v19 }
 0x826   : > { %v1110_v21 = vpop.xlane.xlu1 %1109 }
 0x827   : > { %v1116_v22 = vadd.f32 %v1328_v20, %v1110_v21 }
 0x829   : > { %1118 = vst.msk [vmem:[%s2148_s8] sm:$0xff] %vm1117_vm2, %v1116_v22 }
 0x82a PF: > { %s2183_s30 = sld [smem:[#allocation15_spill]]  ;;  %s2186_s27 = smov %s1726_s28 }
 0x82b   : > { %s2184_s17 = sld [smem:[#allocation14_spill]] }
 0x82c   : > { %s2185_s29 = sld [smem:[#allocation16_spill]] }
 0x830   : > { %p22_p3 = scmp.ge.s32.totalorder %s2183_s30, 6  }
 0x831   : > { %s2187_s28 = smov %s2184_s17 }
 0x832   :  { %24 = sbr.rel (!%p22_p3) target bundleno = 9 (0x9), region = 139 }
 0x837   :  { %1130 = vsyncpa [#allocation4], 1 }
 0x838   :  { %1132 = vsyncpa [#allocation4 + $0x1], 1 }
 0x839   :  { %1133 = vsyncpa [#allocation6], 1 }
 0x83a   :  { %1135 = vsyncpa [#allocation6 + $0x1], 1 }
 0x83b   :  { %1136 = vsyncpa [#allocation9], 1 }
 0x83c   :  { %1138 = vsyncpa [#allocation9 + $0x1], 1 }

</bundles_post_ra>
